<compile_context>
chip_gen: v6e
topology: v6e:2x2x1
jax: 0.10.0
libtpu: 0.0.40
codegen_flags: <defaults>
</compile_context>

<pallas_src>
import jax
import jax.numpy as jnp
from jax.experimental import pallas as pl
from jax.experimental.pallas import tpu as pltpu


def attn_encoder_kernel(x_ref, mask_ref, w_ref, out_ref, m_sc, l_sc, acc_sc):
    # x_ref:    (tb, tl, D) VMEM, native dtype (f32 or bf16)
    # mask_ref: (tb, tl)    VMEM, f32, lane-dense
    # w_ref:    (1, D)      VMEM, native dtype (torch Linear(D,1,bias=False).weight)
    # out_ref:  (tb, D)     VMEM
    # m_sc/l_sc: (tb, 1, 1) f32 scratch; acc_sc: (tb, 1, D) f32 scratch
    li = pl.program_id(1)

    @pl.when(li == 0)
    def _init():
        m_sc[...] = jnp.full_like(m_sc, -jnp.inf)
        l_sc[...] = jnp.zeros_like(l_sc)
        acc_sc[...] = jnp.zeros_like(acc_sc)

    tb, tl, D = x_ref.shape
    x = x_ref[...]                                   # native dtype, no f32 copy
    w = w_ref[...]                                   # (1, D)

    # Additive mask bias, built lane-dense then re-laid out to the score layout
    # (tb*tl elements through the XLU -- negligible vs. the (tb, tl, D) slab).
    bias = (mask_ref[...] - 1.0) * 1.0e8             # (tb, tl) f32
    bias = bias.reshape(tb, tl, 1)                   # (tb, tl, 1)

    # attn_linear on the MXU: (tb*tl, D) @ (D, 1), f32 accumulation.
    # The tile picker keeps tl a multiple of 8 (or tl == L) so the flatten is a
    # free re-view rather than a relayout.
    scores = jax.lax.dot_general(
        x.reshape(tb * tl, D), w,
        dimension_numbers=(((1,), (1,)), ((), ())),
        preferred_element_type=jnp.float32)          # (tb*tl, 1)
    scores = scores.reshape(tb, tl, 1) + bias        # (tb, tl, 1)

    # Online softmax over the sequence axis (axis=1); normalization deferred.
    m_prev = m_sc[...]                                               # (tb, 1, 1)
    m_new = jnp.maximum(m_prev, jnp.max(scores, axis=1, keepdims=True))
    alpha = jnp.exp(m_prev - m_new)                                  # (tb, 1, 1)
    e = jnp.exp(scores - m_new)                                      # (tb, tl, 1) f32
    l_sc[...] = alpha * l_sc[...] + jnp.sum(e, axis=1, keepdims=True)
    m_sc[...] = m_new

    # Unnormalized weighted pooling on the MXU: (tb, 1, tl) @ (tb, tl, D).
    # e_t transpose is tb*tl elements (tiny, XLU); weights cast to x.dtype,
    # accumulation stays f32 via preferred_element_type.
    e_t = jnp.transpose(e, (0, 2, 1)).astype(x.dtype)                # (tb, 1, tl)
    pooled = jnp.einsum('bql,bld->bqd', e_t, x,
                        preferred_element_type=jnp.float32)          # (tb, 1, D)
    acc_sc[...] = alpha * acc_sc[...] + pooled

    @pl.when(li == pl.num_programs(1) - 1)
    def _finalize():
        out = acc_sc[...] / l_sc[...]                # exact softmax denominator
        out_ref[...] = out.reshape(tb, D).astype(out_ref.dtype)


def _round_up(v, m):
    return ((v + m - 1) // m) * m


def _tile_vmem_bytes(tb, tl, D, x_itemsize, out_itemsize):
    """(8,128)-tiled VMEM footprint of one grid step: double-buffered pipeline
    blocks + persistent scratch + f32 in-kernel intermediates."""
    f32 = 4
    x_blk = tb * _round_up(tl, 8) * _round_up(D, 128) * x_itemsize
    mask_blk = _round_up(tb, 8) * _round_up(tl, 128) * f32
    w_blk = 8 * _round_up(D, 128) * x_itemsize
    out_blk = _round_up(tb, 8) * _round_up(D, 128) * out_itemsize
    pipelined = 2 * (x_blk + mask_blk + w_blk + out_blk)      # Buffered(2) default
    scratch = 2 * tb * 8 * 128 * f32                          # m_sc, l_sc (tb,1,1)
    scratch += tb * 8 * _round_up(D, 128) * f32               # acc_sc (tb,1,D)
    interm = 3 * tb * _round_up(tl, 8) * 128 * f32            # scores / e / e_t
    interm += tb * 8 * _round_up(D, 128) * f32                # pooled (tb,1,D)
    return pipelined + scratch + interm


def _chip_info():
    """(physical VMEM bytes, has-two-TensorCores) with conservative fallbacks."""
    vmem = 64 * 1024 * 1024          # v7x per-TensorCore VMEM (most conservative)
    two_tc = False
    try:
        vmem = int(pltpu.get_tpu_info().vmem_capacity_bytes)
    except Exception:
        pass
    try:
        two_tc = "v7" in jax.devices()[0].device_kind.lower()
    except Exception:
        pass
    return vmem, two_tc


def _pick_tiles(B, L, D, x_itemsize, out_itemsize, vmem_budget, two_tc):
    """Pick (tb, tl) honouring Mosaic's (8,128) block constraint:
       tb in {multiples of 8 dividing B} ∪ {B};  tl in {multiples of 128 dividing L} ∪ {L}."""
    tb_cands = sorted({B} | {t for t in range(8, B + 1, 8) if B % t == 0}, reverse=True)
    tl_cands = sorted({L} | {t for t in range(128, L + 1, 128) if L % t == 0}, reverse=True)

    def fits(tb, tl):
        return _tile_vmem_bytes(tb, tl, D, x_itemsize, out_itemsize) <= vmem_budget

    tb_min = min(tb_cands)

    # L-tile (online-softmax path) only when a full-L block does not fit even at
    # the smallest valid batch tile.
    tl = L
    if not fits(tb_min, tl):
        smaller = [t for t in tl_cands if t < L]
        tl = next((t for t in smaller if fits(tb_min, t)), smaller[-1] if smaller else L)
        # TODO(synk): add a D-tiled path if even a (tb_min, 128, D) block exceeds VMEM.

    # Largest batch tile that fits the budget.
    tb = next((t for t in tb_cands if fits(t, tl)), tb_min)

    # Only on 2-TensorCore chips (v7x): prefer an even, >=2 batch grid so both
    # cores get equal work from the "parallel" batch axis. On v5e/v6e a single
    # TC means bigger slabs are strictly better.
    if two_tc:
        even = [t for t in tb_cands
                if (B // t) >= 2 and (B // t) % 2 == 0 and fits(t, tl)]
        if even:
            tb = max(even)
    return tb, tl


def attn_encoder(x, x_mask, w):
    """x: (B, L, D); x_mask: (B, L); w: (1, D) (torch Linear(D,1).weight) -> (B, D)."""
    B, L, D = x.shape
    x_itemsize = jnp.dtype(x.dtype).itemsize

    phys_vmem, two_tc = _chip_info()
    vmem_budget = (phys_vmem * 3) // 4           # ~96 MiB v5e/v6e, ~48 MiB v7x
    tb, tl = _pick_tiles(B, L, D, x_itemsize, x_itemsize, vmem_budget, two_tc)
    needed = _tile_vmem_bytes(tb, tl, D, x_itemsize, x_itemsize)
    vmem_limit = int(min(phys_vmem, max(vmem_budget, needed + (2 << 20))))

    # Wrapper-side plumbing: mask stays lane-dense (B, L); weight stays (1, D).
    mask_f32 = x_mask.astype(jnp.float32)
    w = w.astype(x.dtype)
    # TODO(synk): if real configs use D % 128 != 0 with large B, pad D in the
    # wrapper (and slice the output) so the (tb, D) store is a full-lane vst.

    grid = (B // tb, L // tl)
    return pl.pallas_call(
        attn_encoder_kernel,
        out_shape=jax.ShapeDtypeStruct((B, D), x.dtype),
        grid_spec=pltpu.PrefetchScalarGridSpec(
            num_scalar_prefetch=0,
            grid=grid,
            in_specs=[
                pl.BlockSpec((tb, tl, D), lambda b, l: (b, l, 0)),   # x (native dtype)
                pl.BlockSpec((tb, tl), lambda b, l: (b, l)),         # mask (lane-dense f32)
                pl.BlockSpec((1, D), lambda b, l: (0, 0)),           # weight (lane-dense)
            ],
            out_specs=pl.BlockSpec((tb, D), lambda b, l: (b, 0)),
            scratch_shapes=[
                pltpu.VMEM((tb, 1, 1), jnp.float32),   # m: running max
                pltpu.VMEM((tb, 1, 1), jnp.float32),   # l: running denominator
                pltpu.VMEM((tb, 1, D), jnp.float32),   # acc: running unnormalized sum
            ],
        ),
        compiler_params=pltpu.CompilerParams(
            dimension_semantics=("parallel", "arbitrary"),
            vmem_limit_bytes=vmem_limit,
        ),
    )(x, mask_f32, w)


def attn_encoder_ref(x, x_mask, w):
    scores = jnp.einsum("bld,od->blo", x, w)               # (B, L, 1)
    scores = scores - (1.0 - x_mask[..., None]) * 1.0e8
    attn = jax.nn.softmax(scores, axis=1)
    return jnp.sum(x * attn, axis=1)


if __name__ == "__main__":
    B, L, D = 2, 8, 32  # batch, seq, d_hid

    key = jax.random.PRNGKey(0)
    kx, km, kw = jax.random.split(key, 3)

    x = jax.random.normal(kx, (B, L, D), dtype=jnp.float32)
    # binary mask with some padded (0) positions; ensure at least one valid per row
    mask = (jax.random.uniform(km, (B, L)) > 0.3).astype(jnp.float32)
    mask = mask.at[:, 0].set(1.0)
    # deterministic Linear(d_hid, 1, bias=False) weight, shape (1, D)
    bound = 1.0 / (D ** 0.5)
    w = jax.random.uniform(kw, (1, D), minval=-bound, maxval=bound, dtype=jnp.float32)

    out = jax.block_until_ready(attn_encoder(x, mask, w))
    ref = attn_encoder_ref(x, mask, w)

    assert out.shape == (B, D)
    # Exact softmax denominator (approx reciprocal removed); tolerance only
    # covers MXU-vs-XLA default-precision matmul rounding.
    assert jnp.allclose(out, ref, atol=5e-3, rtol=5e-3), "mismatch vs reference"

    print("KERNEL_OK")
</pallas_src>

<mosaic_0001>
module attributes {stable_mosaic.version = 11 : i64} {
  func.func @attn_encoder_kernel(%arg0: i32, %arg1: i32, %arg2: memref<2x8x32xf32, #tpu.memory_space<vmem>>, %arg3: memref<2x8xf32, #tpu.memory_space<vmem>>, %arg4: memref<1x32xf32, #tpu.memory_space<vmem>>, %arg5: memref<2x32xf32, #tpu.memory_space<vmem>>, %arg6: memref<2x1x1xf32, #tpu.memory_space<vmem>>, %arg7: memref<2x1x1xf32, #tpu.memory_space<vmem>>, %arg8: memref<2x1x32xf32, #tpu.memory_space<vmem>>) attributes {dimension_semantics = [#tpu.dimension_semantics<parallel>, #tpu.dimension_semantics<arbitrary>], iteration_bounds = array<i64: 1, 1>, scalar_prefetch = 0 : i64, scratch_operands = 3 : i64, tpu.core_type = #tpu.core_type<tc>, window_params = [{transform_indices = @transform_0, window_bounds = array<i64: 2, 8, 32>}, {transform_indices = @transform_1, window_bounds = array<i64: 2, 8>}, {pipeline_mode = #tpu.pipeline_mode<synchronous>, transform_indices = @transform_2, window_bounds = array<i64: 1, 32>}, {transform_indices = @transform_3, window_bounds = array<i64: 2, 32>}]} {
    %c0_i32 = arith.constant 0 : i32
    %0 = arith.cmpi eq, %arg1, %c0_i32 : i32
    %1 = arith.extui %0 : i1 to i32
    %c0_i32_0 = arith.constant 0 : i32
    %2 = arith.cmpi ne, %1, %c0_i32_0 : i32
    scf.if %2 {
      %cst_32 = arith.constant 0xFF800000 : f32
      %41 = vector.broadcast %cst_32 : f32 to vector<2x1x1xf32>
      %c0_33 = arith.constant 0 : index
      %c0_34 = arith.constant 0 : index
      %c0_35 = arith.constant 0 : index
      %42 = vector.load %arg6[%c0_33, %c0_34, %c0_35] : memref<2x1x1xf32, #tpu.memory_space<vmem>>, vector<2x1x1xf32>
      tpu.vector_store %arg6[%c0_33, %c0_34, %c0_35], %41 {strides = array<i32>} : memref<2x1x1xf32, #tpu.memory_space<vmem>>, vector<2x1x1xf32>,
      %cst_36 = arith.constant 0.000000e+00 : f32
      %43 = vector.broadcast %cst_36 : f32 to vector<2x1x1xf32>
      %c0_37 = arith.constant 0 : index
      %c0_38 = arith.constant 0 : index
      %c0_39 = arith.constant 0 : index
      %44 = vector.load %arg7[%c0_37, %c0_38, %c0_39] : memref<2x1x1xf32, #tpu.memory_space<vmem>>, vector<2x1x1xf32>
      tpu.vector_store %arg7[%c0_37, %c0_38, %c0_39], %43 {strides = array<i32>} : memref<2x1x1xf32, #tpu.memory_space<vmem>>, vector<2x1x1xf32>,
      %cst_40 = arith.constant 0.000000e+00 : f32
      %45 = vector.broadcast %cst_40 : f32 to vector<2x1x32xf32>
      %c0_41 = arith.constant 0 : index
      %c0_42 = arith.constant 0 : index
      %c0_43 = arith.constant 0 : index
      %46 = vector.load %arg8[%c0_41, %c0_42, %c0_43] : memref<2x1x32xf32, #tpu.memory_space<vmem>>, vector<2x1x32xf32>
      tpu.vector_store %arg8[%c0_41, %c0_42, %c0_43], %45 {strides = array<i32>} : memref<2x1x32xf32, #tpu.memory_space<vmem>>, vector<2x1x32xf32>,
    } else {
    }
    %c0 = arith.constant 0 : index
    %c0_1 = arith.constant 0 : index
    %c0_2 = arith.constant 0 : index
    %3 = vector.load %arg2[%c0, %c0_1, %c0_2] : memref<2x8x32xf32, #tpu.memory_space<vmem>>, vector<2x8x32xf32>
    %c0_3 = arith.constant 0 : index
    %c0_4 = arith.constant 0 : index
    %4 = vector.load %arg4[%c0_3, %c0_4] : memref<1x32xf32, #tpu.memory_space<vmem>>, vector<1x32xf32>
    %c0_5 = arith.constant 0 : index
    %c0_6 = arith.constant 0 : index
    %5 = vector.load %arg3[%c0_5, %c0_6] : memref<2x8xf32, #tpu.memory_space<vmem>>, vector<2x8xf32>
    %cst = arith.constant 1.000000e+00 : f32
    %6 = vector.broadcast %cst : f32 to vector<2x8xf32>
    %7 = arith.subf %5, %6 : vector<2x8xf32>
    %cst_7 = arith.constant 1.000000e+08 : f32
    %8 = vector.broadcast %cst_7 : f32 to vector<2x8xf32>
    %9 = arith.mulf %7, %8 : vector<2x8xf32>
    %10 = vector.shape_cast %9 : vector<2x8xf32> to vector<2x8x1xf32>
    %11 = vector.shape_cast %3 : vector<2x8x32xf32> to vector<16x32xf32>
    %cst_8 = arith.constant dense<0.000000e+00> : vector<16x1xf32>
    %12 = tpu.matmul %11, %4, %cst_8 {dimension_numbers = #tpu.dot_dimension_numbers<[1], [1], [0], [0], [0, 0, 1, 0], [], []>} : vector<16x32xf32>, vector<1x32xf32>, vector<16x1xf32> -> vector<16x1xf32>
    %13 = vector.shape_cast %12 : vector<16x1xf32> to vector<2x8x1xf32>
    %14 = arith.addf %13, %10 : vector<2x8x1xf32>
    %c0_9 = arith.constant 0 : index
    %c0_10 = arith.constant 0 : index
    %c0_11 = arith.constant 0 : index
    %15 = vector.load %arg6[%c0_9, %c0_10, %c0_11] : memref<2x1x1xf32, #tpu.memory_space<vmem>>, vector<2x1x1xf32>
    %cst_12 = arith.constant dense<0xFF800000> : vector<2x1xf32>
    %16 = vector.multi_reduction <maximumf>, %14, %cst_12 [1] : vector<2x8x1xf32> to vector<2x1xf32>
    %17 = vector.shape_cast %16 : vector<2x1xf32> to vector<2x1x1xf32>
    %18 = arith.maximumf %15, %17 : vector<2x1x1xf32>
    %19 = arith.subf %15, %18 : vector<2x1x1xf32>
    %20 = math.exp %19 : vector<2x1x1xf32>
    %21 = vector.broadcast %18 : vector<2x1x1xf32> to vector<2x8x1xf32>
    %22 = arith.subf %14, %21 : vector<2x8x1xf32>
    %23 = math.exp %22 : vector<2x8x1xf32>
    %c0_13 = arith.constant 0 : index
    %c0_14 = arith.constant 0 : index
    %c0_15 = arith.constant 0 : index
    %24 = vector.load %arg7[%c0_13, %c0_14, %c0_15] : memref<2x1x1xf32, #tpu.memory_space<vmem>>, vector<2x1x1xf32>
    %25 = arith.mulf %20, %24 : vector<2x1x1xf32>
    %cst_16 = arith.constant dense<0.000000e+00> : vector<2x1xf32>
    %26 = vector.multi_reduction <add>, %23, %cst_16 [1] : vector<2x8x1xf32> to vector<2x1xf32>
    %27 = vector.shape_cast %26 : vector<2x1xf32> to vector<2x1x1xf32>
    %28 = arith.addf %25, %27 : vector<2x1x1xf32>
    %c0_17 = arith.constant 0 : index
    %c0_18 = arith.constant 0 : index
    %c0_19 = arith.constant 0 : index
    %29 = vector.load %arg7[%c0_17, %c0_18, %c0_19] : memref<2x1x1xf32, #tpu.memory_space<vmem>>, vector<2x1x1xf32>
    tpu.vector_store %arg7[%c0_17, %c0_18, %c0_19], %28 {strides = array<i32>} : memref<2x1x1xf32, #tpu.memory_space<vmem>>, vector<2x1x1xf32>,
    %c0_20 = arith.constant 0 : index
    %c0_21 = arith.constant 0 : index
    %c0_22 = arith.constant 0 : index
    %30 = vector.load %arg6[%c0_20, %c0_21, %c0_22] : memref<2x1x1xf32, #tpu.memory_space<vmem>>, vector<2x1x1xf32>
    tpu.vector_store %arg6[%c0_20, %c0_21, %c0_22], %18 {strides = array<i32>} : memref<2x1x1xf32, #tpu.memory_space<vmem>>, vector<2x1x1xf32>,
    %31 = tpu.transpose %23, [0, 2, 1] : vector<2x8x1xf32> -> vector<2x1x8xf32>
    "tpu.trace_start"() <{level = 10 : i32, message = "bql,bld->bqd"}> : () -> ()
    %cst_23 = arith.constant dense<0.000000e+00> : vector<2x1x32xf32>
    %32 = tpu.matmul %31, %3, %cst_23 {dimension_numbers = #tpu.dot_dimension_numbers<[2], [1], [1], [2], [0, 0, 0, 1, 1, 2], [0], [0]>} : vector<2x1x8xf32>, vector<2x8x32xf32>, vector<2x1x32xf32> -> vector<2x1x32xf32>
    "tpu.trace_stop"() : () -> ()
    %c0_24 = arith.constant 0 : index
    %c0_25 = arith.constant 0 : index
    %c0_26 = arith.constant 0 : index
    %33 = vector.load %arg8[%c0_24, %c0_25, %c0_26] : memref<2x1x32xf32, #tpu.memory_space<vmem>>, vector<2x1x32xf32>
    %34 = vector.broadcast %20 : vector<2x1x1xf32> to vector<2x1x32xf32>
    %35 = arith.mulf %34, %33 : vector<2x1x32xf32>
    %36 = arith.addf %35, %32 : vector<2x1x32xf32>
    %c0_27 = arith.constant 0 : index
    %c0_28 = arith.constant 0 : index
    %c0_29 = arith.constant 0 : index
    %37 = vector.load %arg8[%c0_27, %c0_28, %c0_29] : memref<2x1x32xf32, #tpu.memory_space<vmem>>, vector<2x1x32xf32>
    tpu.vector_store %arg8[%c0_27, %c0_28, %c0_29], %36 {strides = array<i32>} : memref<2x1x32xf32, #tpu.memory_space<vmem>>, vector<2x1x32xf32>,
    %c0_i32_30 = arith.constant 0 : i32
    %38 = arith.cmpi eq, %arg1, %c0_i32_30 : i32
    %39 = arith.extui %38 : i1 to i32
    %c0_i32_31 = arith.constant 0 : i32
    %40 = arith.cmpi ne, %39, %c0_i32_31 : i32
    scf.if %40 {
      %c0_32 = arith.constant 0 : index
      %c0_33 = arith.constant 0 : index
      %c0_34 = arith.constant 0 : index
      %41 = vector.load %arg8[%c0_32, %c0_33, %c0_34] : memref<2x1x32xf32, #tpu.memory_space<vmem>>, vector<2x1x32xf32>
      %c0_35 = arith.constant 0 : index
      %c0_36 = arith.constant 0 : index
      %c0_37 = arith.constant 0 : index
      %42 = vector.load %arg7[%c0_35, %c0_36, %c0_37] : memref<2x1x1xf32, #tpu.memory_space<vmem>>, vector<2x1x1xf32>
      %43 = vector.broadcast %42 : vector<2x1x1xf32> to vector<2x1x32xf32>
      %44 = arith.divf %41, %43 : vector<2x1x32xf32>
      %45 = vector.shape_cast %44 : vector<2x1x32xf32> to vector<2x32xf32>
      %c0_38 = arith.constant 0 : index
      %c0_39 = arith.constant 0 : index
      %46 = vector.load %arg5[%c0_38, %c0_39] : memref<2x32xf32, #tpu.memory_space<vmem>>, vector<2x32xf32>
      tpu.vector_store %arg5[%c0_38, %c0_39], %45 {strides = array<i32>} : memref<2x32xf32, #tpu.memory_space<vmem>>, vector<2x32xf32>,
    } else {
    }
    return
  }
  func.func @transform_0(%arg0: i32, %arg1: i32) -> (i32, i32, i32) {
    %c0_i32 = arith.constant 0 : i32
    %c0_i32_0 = arith.constant 0 : i32
    return %arg0, %arg1, %c0_i32 : i32, i32, i32
  }
  func.func @transform_1(%arg0: i32, %arg1: i32) -> (i32, i32) {
    %c0_i32 = arith.constant 0 : i32
    return %arg0, %arg1 : i32, i32
  }
  func.func @transform_2(%arg0: i32, %arg1: i32) -> (i32, i32) {
    %c0_i32 = arith.constant 0 : i32
    %c0_i32_0 = arith.constant 0 : i32
    %c0_i32_1 = arith.constant 0 : i32
    return %c0_i32, %c0_i32_0 : i32, i32
  }
  func.func @transform_3(%arg0: i32, %arg1: i32) -> (i32, i32) {
    %c0_i32 = arith.constant 0 : i32
    %c0_i32_0 = arith.constant 0 : i32
    return %arg0, %c0_i32 : i32, i32
  }
}

</mosaic_0001>

<bundles_post_ra>
// kernel: tpu_custom_call.1
= control target key start
LH: loop header
LB: loop body
LE: loop exit
PB: predicated region body
PF: predicated region fallthrough
CT: control target
= control target key end

     0   :  { %8 = vsyncpa [#allocation6], 0  ;;  %s643_s0 = inlined_call_operand.hbm [shape: f32[2,8,32], index: 0, kind: input, shape index: {}]   ;;  %s644_s1 = inlined_call_operand.hbm [shape: f32[2,8], index: 1, kind: input, shape index: {}]   ;;  %s645_s2 = inlined_call_operand.vmem [shape: f32[1,32], index: 2, kind: input, shape index: {}]   ;;  %s646_s3 = inlined_call_operand.hbm [shape: f32[2,32], index: 3, kind: output, shape index: {}]  }
   0x1   :  { %9 = vsyncpa [#allocation9], 0 }
   0x2   :  { %10 = vsyncpa [#allocation7], 0  ;;  %s567_s12 = smov [#allocation5]  }
   0x3   :  { %s16_s13 = sshll.u32 %s567_s12, 4  ;;  %s17_s13 = int_to_ptr.vmem [resolvable:$true] %s16_s13 }
   0x4   :  { %s509_s14 = scalar_lea.vmem %s17_s13, 256  ;;  %p514_p1 = scmp.lt.s32.totalorder %s17_s13, %s17_s13 }
   0x5   :  { %p510_p0 = scmp.ne.s32.totalorder %s17_s13, %s509_s14  ;;  %p515_p2 = scmp.lt.s32.totalorder %s509_s14, %s509_s14 }
   0x7   :  { %p516_p3 = por %p515_p2, %p514_p1 }
   0x9   :  { %p517_p4 = pnand %p516_p3, %p510_p0 }
   0xb   :  { %520 = shalt.err (!%p517_p4)
}
   0xc   :  { %s568_s15 = smov 128   ;;  %s569_s16 = smov 8  }
   0xd   :  { %22 = dma.hbm_to_vmem [thread:$0]  %s643_s0, 256, %s17_s13, [#allocation6], %s568_s15, %s568_s15, %s569_s16  }
   0xe   :  { %s570_s19 = smov [#allocation8]  }
   0xf   :  { %s29_s20 = sshll.u32 %s570_s19, 4  ;;  %s30_s20 = int_to_ptr.vmem [resolvable:$true] %s29_s20 }
  0x10   :  { %s529_s21 = scalar_lea.vmem %s30_s20, 32  ;;  %p534_p6 = scmp.lt.s32.totalorder %s30_s20, %s30_s20 }
  0x11   :  { %p530_p5 = scmp.ne.s32.totalorder %s30_s20, %s529_s21  ;;  %p535_p7 = scmp.lt.s32.totalorder %s529_s21, %s529_s21 }
  0x13   :  { %p536_p8 = por %p535_p7, %p534_p6 }
  0x15   :  { %p537_p9 = pnand %p536_p8, %p530_p5 }
  0x17   :  { %540 = shalt.err (!%p537_p9)
}
  0x18   :  { %32 = dma.hbm_to_vmem [thread:$0]  %s644_s1, 32, %s30_s20, [#allocation9]  }
  0x19   :  { %561 = dma.done.wait [#allocation6], 256  }
  0x1a   :  { %562 = vsyncadd [#allocation6], 4294967040 }
  0x1b   :  { %563 = dma.done.wait [#allocation9], 32  }
  0x1c   :  { %564 = vsyncadd [#allocation9], 4294967264  ;;  %v59_v0 = vlaneseq  ;;  %vm45_vm0 = vcmask 0   ;;  %v571_v1 = vmov -inf   ;;  %v572_v2 = vmov 0.0   ;;  %v53_v4 = vld [vmem:[#allocation5] sm:$0xff] }
  0x1d   :  { %46 = vst.msk [vmem:[#allocation2] sm:$0x1] %vm45_vm0, %v571_v1  ;;  %48 = vst.msk [vmem:[#allocation3] sm:$0x1] %vm45_vm0, %v572_v2  ;;  %467 = vmatprep.subr.mxu0 %v572_v2  ;;  %472 = vmatprep.subr.mxu1 %v572_v2  ;;  %v460_v5 = vld [vmem:[%s645_s2] ss:$0 sm:$0xff] }
  0x1e   :  { %49 = vst.msk [vmem:[#allocation3 + $0x1] sm:$0x1] %vm45_vm0, %v572_v2  ;;  %47 = vst.msk [vmem:[#allocation2 + $0x1] sm:$0x1] %vm45_vm0, %v571_v1  ;;  %v611_v3 = vshrl.u32 %v59_v0, 7  ;;  %vm81_vm1 = vcmask 261120   ;;  %v79_v7 = vmul.f32 %v460_v5, %v53_v4  ;;  %468 = vmatpush3.msra.mxu0 %v53_v4 }
  0x1f   :  { %v54_v6 = vld [vmem:[#allocation5 + $0x8] sm:$0xff]  ;;  %v56_v9 = vld [vmem:[#allocation8] sm:$0x3]  ;;  %vm573_vm2 = vmmov 0   ;;  %vm134_vm3 = vcmask 7168   ;;  %vm50_vm4 = vcmask 253952  }
  0x20   :  { %v80_v8 = vmul.f32 %v460_v5, %v54_v6  ;;  %473 = vmatpush3.msra.mxu1 %v54_v6  ;;  %v459_v10 = vadd.f32 -1.0, %v56_v9  ;;  %v617_v11 = vsub.s32 0, %v611_v3  ;;  %v82_v12 = vsel %vm81_vm1, %v79_v7, 0.0  ;;  %469 = vmatprep.mubr.msk.f32.mxu0 %vm573_vm2, %v572_v2  ;;  %51 = vst.msk [vmem:[#allocation4] sm:$0x1] %vm50_vm4, %v572_v2  ;;  %s576_s2 = smov [#allocation10]  }
  0x21   :  { %83 = vadd.xlane.f32.xlu0 %v82_v12  ;;  %v68_v14 = vsub.s32 1, %v611_v3  ;;  %474 = vmatprep.mubr.msk.f32.mxu1 %vm573_vm2, %v572_v2  ;;  %52 = vst.msk [vmem:[#allocation4 + $0x1] sm:$0x1] %vm50_vm4, %v572_v2  ;;  %vm220_vm5 = vcmask 64512   ;;  %s449_s24 = sshll.u32 %s576_s2, 4  ;;  %vm441_vm6 = vcmask 254976   ;;  %s450_s24 = int_to_ptr.vmem [resolvable:$true] %s449_s24 }
  0x22   :  { %v58_v13 = vmul.f32 1e+08, %v459_v10  ;;  %v85_v15 = vsel %vm81_vm1, %v80_v8, 0.0  ;;  %s541_s25 = scalar_lea.vmem %s450_s24, 32  ;;  %p546_p11 = scmp.lt.s32.totalorder %s450_s24, %s450_s24 }
  0x23   :  { %p542_p10 = scmp.ne.s32.totalorder %s450_s24, %s541_s25  ;;  %p547_p12 = scmp.lt.s32.totalorder %s541_s25, %s541_s25 }
  0x24   :  { %v62_v16 = vrot.slane %v58_v13, %v617_v11  ;;  %v69_v17 = vrot.slane %v58_v13, %v68_v14  ;;  %v90_v32 = vld [vmem:[#allocation2] sm:$0x1]  ;;  %v130_v61 = vld [vmem:[#allocation3] sm:$0x1]  ;;  %v574_v13 = vmov 0  }
  0x25   :  { %86 = vadd.xlane.f32.xlu0 %v85_v15  ;;  %v91_v37 = vld [vmem:[#allocation2 + $0x1] sm:$0x1]  ;;  %v131_v6 = vld [vmem:[#allocation3 + $0x1] sm:$0x1]  ;;  %p548_p13 = por %p547_p12, %p546_p11 }
  0x26   :  { %64 = vbcast.lane.b32.xlu1 %v62_v16, 256 }
  0x27   :  { %p549_p0 = pnand %p548_p13, %p542_p10 }
  0x2a   :  { %71 = vbcast.lane.b32.xlu1 %v69_v17, 256 }
  0x98   :  { %v65_v18 = vpop.permute.xlu1 %64 }
  0x9c   :  { %v72_v21 = vpop.permute.xlu1 %71 }
  0xaa   :  { %v84_v19 = vpop.xlane.xlu0 %83 }
  0xab   :  { %v88_v20 = vadd.f32 %v84_v19, %v65_v18 }
  0xad   :  { %v92_v22 = vrot.slane %v88_v20, 4 }
  0xae   :  { %v87_v23 = vpop.xlane.xlu0 %86 }
  0xaf   :  { %v93_v24 = vmax.f32 %v88_v20, %v92_v22  ;;  %v89_v25 = vadd.f32 %v87_v23, %v72_v21  ;;  %v367_v23 = vld [vmem:[#allocation4] sm:$0x1] }
  0xb1   :  { %v94_v26 = vrot.slane %v93_v24, 2  ;;  %v98_v27 = vrot.slane %v89_v25, 4 }
  0xb3   :  { %v95_v28 = vmax.f32 %v93_v24, %v94_v26  ;;  %v99_v29 = vmax.f32 %v89_v25, %v98_v27 }
  0xb5   :  { %v96_v30 = vrot.slane %v95_v28, 1  ;;  %v100_v31 = vrot.slane %v99_v29, 2 }
  0xb7   :  { %v97_v33 = vmax.f32 %v95_v28, %v96_v30  ;;  %v101_v34 = vmax.f32 %v99_v29, %v100_v31  ;;  %v368_v28 = vld [vmem:[#allocation4 + $0x1] sm:$0x1] }
  0xb9   :  { %v104_v35 = vmax.f32 %v90_v32, %v97_v33  ;;  %v102_v36 = vrot.slane %v101_v34, 1 }
  0xbb   :  { %v117_v38 = vrot.slane %v104_v35, %v617_v11  ;;  %154 = vst.msk [vmem:[#allocation2] sm:$0x1] %vm45_vm0, %v104_v35  ;;  %v103_v39 = vmax.f32 %v101_v34, %v102_v36  ;;  %v106_v45 = vsub.f32 %v90_v32, %v104_v35  ;;  %v575_v35 = vmov 1966171168  }
  0xbc   :  { %v427_v36 = vunpack.c.l.s4 %v575_v35 }
  0xbd   :  { %v124_v40 = vsub.f32 %v88_v20, %v117_v38  ;;  %v105_v41 = vmax.f32 %v91_v37, %v103_v39  ;;  %v108_v47 = vmul.f32 1.442695, %v106_v45 }
  0xbf   :  { %v126_v42 = vmul.f32 1.442695, %v124_v40  ;;  %v121_v43 = vrot.slane %v105_v41, %v617_v11  ;;  %155 = vst.msk [vmem:[#allocation2 + $0x1] sm:$0x1] %vm45_vm0, %v105_v41  ;;  %v107_v48 = vsub.f32 %v91_v37, %v105_v41  ;;  %v428_v37 = vunpack.c.0.s8 %v427_v36 }
  0xc1   :  { %489 = vpow2.f32 %v126_v42  ;;  %v125_v44 = vsub.f32 %v89_v25, %v121_v43  ;;  %v110_v49 = vmul.f32 1.442695, %v107_v48  ;;  %v431_v43 = vsub.s32 %v428_v37, %v611_v3 }
  0xc3   :  { %v128_v46 = vmul.f32 1.442695, %v125_v44 }
  0xc5   :  { %491 = vpow2.f32 %v128_v46 }
  0xc6   :  { %493 = vpow2.f32 %v108_v47 }
  0xc7   :  { %495 = vpow2.f32 %v110_v49 }
  0xce   :  { %v490_v50 = vpop.eup %489 }
  0xcf   :  { %v135_v51 = vsel %vm134_vm3, %v490_v50, 0.0  ;;  %156 = vxpose.xlu0.b32.start.end [1/1] (short) (narrow) %v490_v50, 8 }
  0xd0   :  { %v136_v52 = vrot.slane %v135_v51, 4 }
  0xd2   :  { %v492_v53 = vpop.eup %491  ;;  %v137_v54 = vadd.f32 %v136_v52, %v135_v51 }
  0xd3   :  { %v142_v55 = vsel %vm134_vm3, %v492_v53, 0.0  ;;  %188 = vxpose.xlu1.b32.start.end [1/1] (short) (narrow) %v492_v53, 8  ;;  %v494_v60 = vpop.eup %493 }
  0xd4   :  { %v138_v56 = vrot.slane %v137_v54, 2  ;;  %v143_v57 = vrot.slane %v142_v55, 4  ;;  %v132_v0 = vmul.f32 %v494_v60, %v130_v61  ;;  %v496_v5 = vpop.eup %495 }
  0xd5   :  { %v133_v9 = vmul.f32 %v496_v5, %v131_v6 }
  0xd6   :  { %v139_v58 = vadd.f32 %v138_v56, %v137_v54  ;;  %v144_v59 = vadd.f32 %v143_v57, %v142_v55 }
  0xd8   :  { %v140_v62 = vrot.slane %v139_v58, 1  ;;  %v145_v63 = vrot.slane %v144_v59, 2 }
  0xda   :  { %v141_v1 = vadd.f32 %v140_v62, %v139_v58  ;;  %v146_v4 = vadd.f32 %v145_v63, %v144_v59 }
  0xdc   :  { %v149_v7 = vadd.f32 %v141_v1, %v132_v0  ;;  %v147_v8 = vrot.slane %v146_v4, 1 }
  0xde   :  { %152 = vst.msk [vmem:[#allocation3] sm:$0x1] %vm45_vm0, %v149_v7  ;;  %v148_v10 = vadd.f32 %v147_v8, %v146_v4 }
  0xe0   :  { %v150_v12 = vadd.f32 %v148_v10, %v133_v9 }
  0xe2   :  { %153 = vst.msk [vmem:[#allocation3 + $0x1] sm:$0x1] %vm45_vm0, %v150_v12 }
  0xe5   :  { %v399_v14 = vld [vmem:[#allocation3] sm:$0x1] }
  0xe9   :  { %v400_v15 = vld [vmem:[#allocation3 + $0x1] sm:$0x1] }
  0xf1   :  { %487 = vset.pattern.permute.xlu1 %v574_v13 }
  0xf2   :  { %403 = vperm.xlu1 %487, %v399_v14  }
  0xf6   :  { %371 = vperm.xlu1 %487, %v494_v60  }
  0xf8   :  { %488 = vset.pattern.permute.xlu0 %v574_v13 }
  0xf9   :  { %412 = vperm.xlu0 %488, %v400_v15  }
  0xfa   :  { %380 = vperm.xlu1 %487, %v496_v5  }
 0x14b   :  { %v172_v16 = vpop.trf.xlu0 }
 0x14c   :  { %470 = vmatmul.mubr.msk.f32.vlgmr.msra.gmra.mxu0 %vm220_vm5, %v172_v16 }
 0x14f   :  { %v204_v17 = vpop.trf.xlu1 }
 0x150   :  { %475 = vmatmul.mubr.msk.f32.vlgmr.msra.gmra.mxu1 %vm220_vm5, %v204_v17 }
 0x16d   :  { %v404_v18 = vpop.permute.xlu1 %403 }
 0x16e   :  { %v409_v2 = vrot.slane %v404_v18, %v617_v11 }
 0x170   :  { %497 = vrcp.f32 %v409_v2 }
 0x171   :  { %v372_v19 = vpop.permute.xlu1 %371 }
 0x172   :  { %v377_v21 = vrot.slane %v372_v19, %v617_v11 }
 0x174   :  { %v413_v20 = vpop.permute.xlu0 %412  ;;  %v387_v26 = vmul.f32 %v377_v21, %v367_v23 }
 0x175   :  { %v381_v22 = vpop.permute.xlu1 %380  ;;  %v418_v24 = vrot.slane %v413_v20, %v617_v11 }
 0x176   :  { %v386_v25 = vrot.slane %v381_v22, %v617_v11 }
 0x177   :  { %499 = vrcp.f32 %v418_v24 }
 0x178   :  { %v388_v31 = vmul.f32 %v386_v25, %v368_v28 }
 0x17d   :  { %v498_v11 = vpop.eup %497 }
 0x184   :  { %v500_v39 = vpop.eup %499 }
 0x20c   :  { %v290_v27 = vpop.f32.mrf.mxu0 }
 0x20d   :  { %v389_v29 = vadd.f32 %v387_v26, %v290_v27 }
 0x20e   :  { %v471_v30 = vpop.f32.mrf.mxu0 }
 0x20f   :  { %392 = vst.msk [vmem:[#allocation4] sm:$0x1] %vm50_vm4, %v389_v29 }
 0x210   :  { %v363_v32 = vpop.f32.mrf.mxu1 }
 0x211   :  { %v390_v33 = vadd.f32 %v388_v31, %v363_v32 }
 0x212   :  { %v476_v34 = vpop.f32.mrf.mxu1 }
 0x213   :  { %393 = vst.msk [vmem:[#allocation4 + $0x1] sm:$0x1] %vm50_vm4, %v390_v33 }
 0x216   :  { %v397_v38 = vld [vmem:[#allocation4] sm:$0x1] }
 0x217   :  { %v420_v41 = vmul.f32 %v498_v11, %v397_v38 }
 0x21a   :  { %v398_v40 = vld [vmem:[#allocation4 + $0x1] sm:$0x1] }
 0x21b   :  { %v422_v42 = vmul.f32 %v500_v39, %v398_v40 }
 0x21d   :  { %v425_v44 = vcombine.low %v420_v41, %v422_v42 }
 0x21f   :  { %v432_v45 = vrot.slane %v425_v44, %v431_v43 }
 0x221   :  { %v439_v46 = vrot.slane %v432_v45, %v431_v43 }
 0x223   :  { %442 = vst.msk [vmem:[#allocation10] sm:$0x3] %vm441_vm6, %v439_v46 }
 0x224   :  { %552 = shalt.err (!%p549_p0)
}
 0x225   :  { %452 = dma.vmem_to_hbm [thread:$0]  %s450_s24, 32, %s646_s3, [#allocation7]  }
 0x226   :  { %565 = dma.done.wait [#allocation7], 32  }
 0x227   :  { %566 = vsyncadd [#allocation7], 4294967264 }
 0x228   :  { %456 = vsyncpa [#allocation6], 1 }
 0x229   :  { %457 = vsyncpa [#allocation9], 1 }
 0x22a   :  { %458 = vsyncpa [#allocation7], 1 }

</bundles_post_ra>
